<compile_context>
chip_gen: v7x
topology: tpu7x:2x2x1
jax: 0.10.0
libtpu: 0.0.40
codegen_flags: <defaults>
</compile_context>

<pallas_src>
import functools

import jax
import jax.numpy as jnp
from jax.experimental import pallas as pl
from jax.experimental.pallas import tpu as pltpu

LANES = 128
CHUNK = 512           # lanes processed per inner-loop step (multiple of 128)


def _round_up(x, m):
    return ((x + m - 1) // m) * m


def _padded_rows(rows, itemsize):
    """Sublane-padded row count of a (rows, lanes) VMEM block with `itemsize`-byte elems."""
    packing = max(1, 4 // itemsize)
    return _round_up(rows, 8 * packing)


def _dice_sums_kernel(score_ref, labels_ref, inter_ref, zsum_ref, ysum_ref, *,
                      apply_softmax, chunk, chunks_per_tile, num_tiles,
                      tiles_per_split, tail_valid, needs_mask, may_skip):
    h = pl.program_id(0)                    # core-split index
    i = pl.program_id(2)                    # spatial-tile index within this split
    g = h * tiles_per_split + i             # global spatial-tile index

    @pl.when(i == 0)
    def _init():
        inter_ref[...] = jnp.zeros_like(inter_ref)
        zsum_ref[...] = jnp.zeros_like(zsum_ref)
        ysum_ref[...] = jnp.zeros_like(ysum_ref)

    c = score_ref.shape[0]
    # Hoisted out of the chunk loops (JAX does not CSE broadcast_in_dim).
    class_ids = jax.lax.broadcasted_iota(jnp.int32, (c, chunk), 0)

    def fold(x):
        # (C, chunk) -> (C, 128): pairwise tree over static 128-lane blocks
        # (pure VPU adds, no serial chain of length chunk/128).
        blocks = [x[:, k * LANES:(k + 1) * LANES] for k in range(chunk // LANES)]
        while len(blocks) > 1:
            nxt = [blocks[a] + blocks[a + 1] for a in range(0, len(blocks) - 1, 2)]
            if len(blocks) % 2:
                nxt.append(blocks[-1])
            blocks = nxt
        return blocks[0]

    def chunk_sums(s, lab, valid):
        # s: (C, chunk) f32 scores; lab: (1, chunk) i32; valid: None or (1, chunk) bool.
        if apply_softmax:
            e = jnp.exp(s - jnp.max(s, axis=0, keepdims=True))            # EUP
            inv = pl.reciprocal(jnp.sum(e, axis=0, keepdims=True), approx=False)
            s = e * inv                                                   # (C,chunk) mul
        if valid is not None:
            # Post-softmax select + label=-1 select neutralize OOB garbage lanes.
            s = jnp.where(valid, s, 0.0)
            lab = jnp.where(valid, lab, -1)
        is_class = lab == class_ids
        return (fold(jnp.where(is_class, s, 0.0)),      # intersect
                fold(s * s),                            # z_sum
                fold(jnp.where(is_class, 1.0, 0.0)))    # y_sum (one-hot^2 == one-hot)

    def flush(parts):
        i_acc, z_acc, y_acc = parts
        inter_ref[0, 0] += i_acc
        zsum_ref[0, 0] += z_acc
        ysum_ref[0, 0] += y_acc

    def full_chunks(n_chunks):
        # Fast path (no masking): accumulate in vreg carries, one ref update at end.
        def body(j, carry):
            i_acc, z_acc, y_acc = carry
            start = pl.multiple_of(j * chunk, chunk)
            s = score_ref[:, pl.ds(start, chunk)].astype(jnp.float32)
            lab = labels_ref[:, pl.ds(start, chunk)].astype(jnp.int32)
            di, dz, dy = chunk_sums(s, lab, None)
            return i_acc + di, z_acc + dz, y_acc + dy
        zero = jnp.zeros((c, LANES), jnp.float32)
        flush(jax.lax.fori_loop(0, n_chunks, body, (zero, zero, zero),
                                unroll=min(2, n_chunks)))

    def masked_chunk(chunk_idx, n_valid):
        # Single ragged chunk of the last spatial tile (static position / count).
        start = chunk_idx * chunk
        s = score_ref[:, pl.ds(start, chunk)].astype(jnp.float32)
        lab = labels_ref[:, pl.ds(start, chunk)].astype(jnp.int32)
        valid = jax.lax.broadcasted_iota(jnp.int32, (1, chunk), 1) < n_valid
        flush(chunk_sums(s, lab, valid))

    if needs_mask:
        @pl.when(g < num_tiles - 1)
        def _full_tile():
            full_chunks(chunks_per_tile)

        @pl.when(g == num_tiles - 1)
        def _last_tile():
            n_full = tail_valid // chunk
            rem = tail_valid - n_full * chunk
            if n_full > 0:
                full_chunks(n_full)
            if rem > 0:
                masked_chunk(n_full, rem)
    elif may_skip:
        @pl.when(g < num_tiles)
        def _full_tile():
            full_chunks(chunks_per_tile)
    else:
        full_chunks(chunks_per_tile)


def _dice_sums(score, labels, *, apply_softmax, tile_m_max=32768):
    """score: (N, C, M) float; labels: (N, 1, M) int -> (intersect, z_sum, y_sum), each (C,)."""
    n, c, m_hw = score.shape
    score_it = jnp.dtype(score.dtype).itemsize
    label_it = jnp.dtype(labels.dtype).itemsize

    try:
        vmem_cap = int(pltpu.get_tpu_info().vmem_capacity_bytes)
    except Exception:
        vmem_cap = 64 * 1024 * 1024          # v7x has the smallest VMEM; be conservative
    vmem_limit = int(min(64 << 20, vmem_cap // 2))

    # Per-lane VMEM bytes of the double-buffered (C, tile_m) score block plus the
    # (1, tile_m) label block, including sublane padding of the second-minor dim.
    per_lane = 2 * (_padded_rows(c, score_it) * score_it
                    + _padded_rows(1, label_it) * label_it)
    budget = vmem_limit // 2                 # headroom for outputs + compiler temps
    tile_m_max = max(CHUNK, (tile_m_max // CHUNK) * CHUNK)
    tile_m = max(CHUNK, min(tile_m_max, (budget // per_lane) // CHUNK * CHUNK))
    num_tiles = pl.cdiv(m_hw, tile_m)
    # Rebalance so tiles are near-equal (core balance; small ragged tail).
    tile_m = max(CHUNK, _round_up(pl.cdiv(m_hw, num_tiles), CHUNK))
    num_tiles = pl.cdiv(m_hw, tile_m)
    needs_mask = (num_tiles * tile_m != m_hw)
    tail_valid = m_hw - (num_tiles - 1) * tile_m

    # v7x: when a single image would leave the 2nd TensorCore idle, split the
    # spatial tiles across a leading size-2 "parallel" axis instead.
    core_split = 2 if (n == 1 and num_tiles >= 2) else 1
    tiles_per_split = pl.cdiv(num_tiles, core_split)
    may_skip = core_split * tiles_per_split != num_tiles

    def spatial_block(h, i):
        g = h * tiles_per_split + i
        if may_skip:                         # redundant trailing tile: clamp + skip
            g = jnp.minimum(g, num_tiles - 1)
        return g

    kernel = functools.partial(
        _dice_sums_kernel, apply_softmax=apply_softmax, chunk=CHUNK,
        chunks_per_tile=tile_m // CHUNK, num_tiles=num_tiles,
        tiles_per_split=tiles_per_split, tail_valid=tail_valid,
        needs_mask=needs_mask, may_skip=may_skip)

    acc_spec = pl.BlockSpec((1, 1, c, LANES), lambda h, b, i: (h, b, 0, 0))
    out_shape = tuple(jax.ShapeDtypeStruct((core_split, n, c, LANES), jnp.float32)
                      for _ in range(3))

    inter, zsum, ysum = pl.pallas_call(
        kernel,
        out_shape=out_shape,
        grid_spec=pltpu.PrefetchScalarGridSpec(
            num_scalar_prefetch=0,
            grid=(core_split, n, tiles_per_split),
            in_specs=[
                pl.BlockSpec((pl.Squeezed(), c, tile_m),
                             lambda h, b, i: (b, 0, spatial_block(h, i))),
                pl.BlockSpec((pl.Squeezed(), 1, tile_m),
                             lambda h, b, i: (b, 0, spatial_block(h, i))),
            ],
            out_specs=[acc_spec, acc_spec, acc_spec],
        ),
        compiler_params=pltpu.CompilerParams(
            dimension_semantics=("parallel", "parallel", "arbitrary"),
            vmem_limit_bytes=vmem_limit,
        ),
    )(score, labels)

    # Tiny final reduction over (core_split, batch) partials and the 128 lanes.
    return (inter.sum(axis=(0, 1, 3)),
            zsum.sum(axis=(0, 1, 3)),
            ysum.sum(axis=(0, 1, 3)))


def dice_loss(inputs, target, n_classes, weight=None, softmax=False, tile_m_max=32768):
    """JAX/Pallas equivalent of DiceLoss.forward.

    inputs: (N, C, H, W) scores in native dtype (f32 or bf16).
    target: (N, H, W) integer class labels in [0, n_classes).
    Returns scalar loss = (1/C) * sum_c weight[c] * (1 - dice_c).
    """
    n, c, h, w = inputs.shape
    assert c == n_classes, f"predict channels {c} != n_classes {n_classes}"
    assert target.shape == (n, h, w)
    m_hw = h * w

    # Zero-copy reshapes; keep native (narrow) dtypes to minimize HBM traffic.
    score = inputs.reshape(n, c, m_hw)
    if not jnp.issubdtype(target.dtype, jnp.integer):
        target = target.astype(jnp.int32)
    labels = target.reshape(n, 1, m_hw)

    intersect, z_sum, y_sum = _dice_sums(
        score, labels, apply_softmax=softmax, tile_m_max=tile_m_max)

    smooth = 1e-5
    dice = 1.0 - (2.0 * intersect + smooth) / (z_sum + y_sum + smooth)  # (C,)

    if weight is None:
        weight = jnp.ones((n_classes,), jnp.float32)
    else:
        weight = jnp.asarray(weight, jnp.float32)
    return jnp.sum(dice * weight) / n_classes
    # TODO(synk): class_wise_dice (per-class .item() host sync) is a diagnostic
    # side list in the PyTorch module and is not part of the returned loss.


def _reference_dice_loss(inputs, target, n_classes, weight=None, softmax=False):
    # Pure-JAX reference mirroring the PyTorch module (sanity check).
    if softmax:
        inputs = jax.nn.softmax(inputs.astype(jnp.float32), axis=1)
    onehot = jax.nn.one_hot(target, n_classes, axis=1, dtype=jnp.float32)  # (N,C,H,W)
    smooth = 1e-5
    if weight is None:
        weight = [1.0] * n_classes
    loss = 0.0
    for i in range(n_classes):
        s = inputs[:, i].astype(jnp.float32)
        t = onehot[:, i]
        inter = jnp.sum(s * t)
        ysum = jnp.sum(t * t)
        zsum = jnp.sum(s * s)
        d = 1.0 - (2.0 * inter + smooth) / (zsum + ysum + smooth)
        loss = loss + d * weight[i]
    return loss / n_classes


if __name__ == "__main__":
    key = jax.random.PRNGKey(0)
    k1, k2, k3, k4 = jax.random.split(key, 4)

    n_classes = 4

    # Case 1: batch=2, f32 scores + fused softmax, int8 labels, ragged spatial tail.
    N, H, W = 2, 16, 16
    x1 = jax.random.normal(k1, (N, n_classes, H, W), dtype=jnp.float32)
    t1 = jax.random.randint(k2, (N, H, W), 0, n_classes, dtype=jnp.int32).astype(jnp.int8)
    f1 = jax.jit(functools.partial(dice_loss, n_classes=n_classes, softmax=True))
    loss1 = jax.block_until_ready(f1(x1, t1))
    ref1 = _reference_dice_loss(x1, t1, n_classes, softmax=True)
    assert jnp.allclose(loss1, ref1, rtol=1e-4, atol=1e-5), (loss1, ref1)

    # Case 2: batch=1 exercises the v7x core-split path (grid (2, 1, tiles)),
    # the clamped/skipped odd trailing tile, multi-chunk fori_loop and the
    # masked tail chunk; tile_m_max=1024 forces several tiles at a small shape.
    H2, W2 = 47, 47
    x2 = jax.nn.softmax(jax.random.normal(k3, (1, n_classes, H2, W2), jnp.float32), axis=1)
    t2 = jax.random.randint(k4, (1, H2, W2), 0, n_classes, dtype=jnp.int32)
    f2 = jax.jit(functools.partial(dice_loss, n_classes=n_classes, softmax=False,
                                   tile_m_max=1024))
    loss2 = jax.block_until_ready(f2(x2, t2))
    ref2 = _reference_dice_loss(x2, t2, n_classes, softmax=False)
    assert jnp.allclose(loss2, ref2, rtol=1e-4, atol=1e-5), (loss2, ref2)

    # Case 3: bf16 scores (bandwidth-limited v5e path); kernel widens per chunk.
    x3 = x1.astype(jnp.bfloat16)
    loss3 = jax.block_until_ready(f1(x3, t1))
    ref3 = _reference_dice_loss(x3, t1, n_classes, softmax=True)
    assert jnp.allclose(loss3, ref3, rtol=1e-3, atol=1e-4), (loss3, ref3)

    print("KERNEL_OK")
</pallas_src>

<mosaic_0001>
module attributes {stable_mosaic.version = 11 : i64} {
  func.func @_dice_sums_kernel(%arg0: i32, %arg1: i32, %arg2: i32, %arg3: memref<1x4x512xf32, #tpu.memory_space<vmem>>, %arg4: memref<1x1x512xi8, #tpu.memory_space<vmem>>, %arg5: memref<1x1x4x128xf32, #tpu.memory_space<vmem>>, %arg6: memref<1x1x4x128xf32, #tpu.memory_space<vmem>>, %arg7: memref<1x1x4x128xf32, #tpu.memory_space<vmem>>) attributes {dimension_semantics = [#tpu.dimension_semantics<parallel>, #tpu.dimension_semantics<parallel>, #tpu.dimension_semantics<arbitrary>], iteration_bounds = array<i64: 1, 2, 1>, scalar_prefetch = 0 : i64, scratch_operands = 0 : i64, tpu.core_type = #tpu.core_type<tc>, window_params = [{transform_indices = @transform_0, window_bounds = array<i64: 1, 4, 512>}, {transform_indices = @transform_1, window_bounds = array<i64: 1, 1, 512>}, {transform_indices = @transform_2, window_bounds = array<i64: 1, 1, 4, 128>}, {transform_indices = @transform_3, window_bounds = array<i64: 1, 1, 4, 128>}, {transform_indices = @transform_4, window_bounds = array<i64: 1, 1, 4, 128>}]} {
    %c1_i32 = arith.constant 1 : i32
    %0 = arith.muli %arg0, %c1_i32 : i32
    %1 = arith.addi %0, %arg2 : i32
    %c0_i32 = arith.constant 0 : i32
    %2 = arith.cmpi eq, %arg2, %c0_i32 : i32
    %3 = arith.extui %2 : i1 to i32
    %c0_i32_0 = arith.constant 0 : i32
    %4 = arith.cmpi ne, %3, %c0_i32_0 : i32
    scf.if %4 {
      %cst = arith.constant 0.000000e+00 : f32
      %12 = vector.broadcast %cst : f32 to vector<1x1x4x128xf32>
      %c0 = arith.constant 0 : index
      %c0_5 = arith.constant 0 : index
      %c0_6 = arith.constant 0 : index
      %c0_7 = arith.constant 0 : index
      %13 = vector.load %arg5[%c0, %c0_5, %c0_6, %c0_7] : memref<1x1x4x128xf32, #tpu.memory_space<vmem>>, vector<1x1x4x128xf32>
      tpu.vector_store %arg5[%c0, %c0_5, %c0_6, %c0_7], %12 {strides = array<i32>} : memref<1x1x4x128xf32, #tpu.memory_space<vmem>>, vector<1x1x4x128xf32>,
      %cst_8 = arith.constant 0.000000e+00 : f32
      %14 = vector.broadcast %cst_8 : f32 to vector<1x1x4x128xf32>
      %c0_9 = arith.constant 0 : index
      %c0_10 = arith.constant 0 : index
      %c0_11 = arith.constant 0 : index
      %c0_12 = arith.constant 0 : index
      %15 = vector.load %arg6[%c0_9, %c0_10, %c0_11, %c0_12] : memref<1x1x4x128xf32, #tpu.memory_space<vmem>>, vector<1x1x4x128xf32>
      tpu.vector_store %arg6[%c0_9, %c0_10, %c0_11, %c0_12], %14 {strides = array<i32>} : memref<1x1x4x128xf32, #tpu.memory_space<vmem>>, vector<1x1x4x128xf32>,
      %cst_13 = arith.constant 0.000000e+00 : f32
      %16 = vector.broadcast %cst_13 : f32 to vector<1x1x4x128xf32>
      %c0_14 = arith.constant 0 : index
      %c0_15 = arith.constant 0 : index
      %c0_16 = arith.constant 0 : index
      %c0_17 = arith.constant 0 : index
      %17 = vector.load %arg7[%c0_14, %c0_15, %c0_16, %c0_17] : memref<1x1x4x128xf32, #tpu.memory_space<vmem>>, vector<1x1x4x128xf32>
      tpu.vector_store %arg7[%c0_14, %c0_15, %c0_16, %c0_17], %16 {strides = array<i32>} : memref<1x1x4x128xf32, #tpu.memory_space<vmem>>, vector<1x1x4x128xf32>,
    } else {
    }
    %5 = tpu.iota {dimensions = array<i32: 0>} : vector<4x512xi32>
    %c0_i32_1 = arith.constant 0 : i32
    %6 = arith.cmpi slt, %1, %c0_i32_1 : i32
    %7 = arith.extui %6 : i1 to i32
    %c0_i32_2 = arith.constant 0 : i32
    %8 = arith.cmpi ne, %7, %c0_i32_2 : i32
    scf.if %8 {
      %cst = arith.constant 0.000000e+00 : f32
      %12 = vector.broadcast %cst : f32 to vector<4x128xf32>
      %c0_i32_5 = arith.constant 0 : i32
      %c512_i32 = arith.constant 512 : i32
      %13 = arith.muli %c0_i32_5, %c512_i32 : i32
      %14 = tpu.assume_multiple %13, 512 : i32
      %c0 = arith.constant 0 : index
      %c0_6 = arith.constant 0 : index
      %15 = arith.index_cast %14 : i32 to index
      %16 = vector.load %arg3[%c0, %c0_6, %15] : memref<1x4x512xf32, #tpu.memory_space<vmem>>, vector<1x4x512xf32>
      %17 = vector.shape_cast %16 : vector<1x4x512xf32> to vector<4x512xf32>
      %c0_7 = arith.constant 0 : index
      %c0_8 = arith.constant 0 : index
      %18 = arith.index_cast %14 : i32 to index
      %19 = vector.load %arg4[%c0_7, %c0_8, %18] : memref<1x1x512xi8, #tpu.memory_space<vmem>>, vector<1x1x512xi8>
      %20 = vector.shape_cast %19 : vector<1x1x512xi8> to vector<1x512xi8>
      %21 = arith.extsi %20 : vector<1x512xi8> to vector<1x512xi32>
      %cst_9 = arith.constant dense<0xFF800000> : vector<512xf32>
      %22 = vector.multi_reduction <maximumf>, %17, %cst_9 [0] : vector<4x512xf32> to vector<512xf32>
      %23 = vector.shape_cast %22 : vector<512xf32> to vector<1x512xf32>
      %24 = vector.broadcast %23 : vector<1x512xf32> to vector<4x512xf32>
      %25 = arith.subf %17, %24 : vector<4x512xf32>
      %26 = math.exp %25 : vector<4x512xf32>
      %cst_10 = arith.constant dense<0.000000e+00> : vector<512xf32>
      %27 = vector.multi_reduction <add>, %26, %cst_10 [0] : vector<4x512xf32> to vector<512xf32>
      %28 = vector.shape_cast %27 : vector<512xf32> to vector<1x512xf32>
      %29 = tpu.reciprocal %28 : vector<1x512xf32> -> vector<1x512xf32>
      %30 = vector.broadcast %29 : vector<1x512xf32> to vector<4x512xf32>
      %31 = arith.mulf %26, %30 : vector<4x512xf32>
      %32 = vector.broadcast %21 : vector<1x512xi32> to vector<4x512xi32>
      %33 = arith.cmpi eq, %32, %5 : vector<4x512xi32>
      %cst_11 = arith.constant 0.000000e+00 : f32
      %34 = vector.broadcast %cst_11 : f32 to vector<4x512xf32>
      %35 = arith.select %33, %31, %34 : vector<4x512xi1>, vector<4x512xf32>
      %36 = vector.extract_strided_slice %35 {offsets = [0, 0], sizes = [4, 128], strides = [1, 1]} : vector<4x512xf32> to vector<4x128xf32>
      %37 = vector.extract_strided_slice %35 {offsets = [0, 128], sizes = [4, 128], strides = [1, 1]} : vector<4x512xf32> to vector<4x128xf32>
      %38 = vector.extract_strided_slice %35 {offsets = [0, 256], sizes = [4, 128], strides = [1, 1]} : vector<4x512xf32> to vector<4x128xf32>
      %39 = vector.extract_strided_slice %35 {offsets = [0, 384], sizes = [4, 128], strides = [1, 1]} : vector<4x512xf32> to vector<4x128xf32>
      %40 = arith.addf %36, %37 : vector<4x128xf32>
      %41 = arith.addf %38, %39 : vector<4x128xf32>
      %42 = arith.addf %40, %41 : vector<4x128xf32>
      %43 = arith.mulf %31, %31 : vector<4x512xf32>
      %44 = vector.extract_strided_slice %43 {offsets = [0, 0], sizes = [4, 128], strides = [1, 1]} : vector<4x512xf32> to vector<4x128xf32>
      %45 = vector.extract_strided_slice %43 {offsets = [0, 128], sizes = [4, 128], strides = [1, 1]} : vector<4x512xf32> to vector<4x128xf32>
      %46 = vector.extract_strided_slice %43 {offsets = [0, 256], sizes = [4, 128], strides = [1, 1]} : vector<4x512xf32> to vector<4x128xf32>
      %47 = vector.extract_strided_slice %43 {offsets = [0, 384], sizes = [4, 128], strides = [1, 1]} : vector<4x512xf32> to vector<4x128xf32>
      %48 = arith.addf %44, %45 : vector<4x128xf32>
      %49 = arith.addf %46, %47 : vector<4x128xf32>
      %50 = arith.addf %48, %49 : vector<4x128xf32>
      %cst_12 = arith.constant 1.000000e+00 : f32
      %cst_13 = arith.constant 0.000000e+00 : f32
      %51 = vector.broadcast %cst_12 : f32 to vector<4x512xf32>
      %52 = vector.broadcast %cst_13 : f32 to vector<4x512xf32>
      %53 = arith.select %33, %51, %52 : vector<4x512xi1>, vector<4x512xf32>
      %54 = vector.extract_strided_slice %53 {offsets = [0, 0], sizes = [4, 128], strides = [1, 1]} : vector<4x512xf32> to vector<4x128xf32>
      %55 = vector.extract_strided_slice %53 {offsets = [0, 128], sizes = [4, 128], strides = [1, 1]} : vector<4x512xf32> to vector<4x128xf32>
      %56 = vector.extract_strided_slice %53 {offsets = [0, 256], sizes = [4, 128], strides = [1, 1]} : vector<4x512xf32> to vector<4x128xf32>
      %57 = vector.extract_strided_slice %53 {offsets = [0, 384], sizes = [4, 128], strides = [1, 1]} : vector<4x512xf32> to vector<4x128xf32>
      %58 = arith.addf %54, %55 : vector<4x128xf32>
      %59 = arith.addf %56, %57 : vector<4x128xf32>
      %60 = arith.addf %58, %59 : vector<4x128xf32>
      %61 = arith.addf %12, %42 : vector<4x128xf32>
      %62 = arith.addf %12, %50 : vector<4x128xf32>
      %63 = arith.addf %12, %60 : vector<4x128xf32>
      %c1_i32_14 = arith.constant 1 : i32
      %c0_15 = arith.constant 0 : index
      %c0_16 = arith.constant 0 : index
      %c0_17 = arith.constant 0 : index
      %c0_18 = arith.constant 0 : index
      %64 = vector.load %arg5[%c0_15, %c0_16, %c0_17, %c0_18] : memref<1x1x4x128xf32, #tpu.memory_space<vmem>>, vector<1x1x4x128xf32>
      %65 = vector.shape_cast %64 : vector<1x1x4x128xf32> to vector<4x128xf32>
      %66 = arith.addf %65, %61 : vector<4x128xf32>
      %c0_19 = arith.constant 0 : index
      %c0_20 = arith.constant 0 : index
      %c0_21 = arith.constant 0 : index
      %c0_22 = arith.constant 0 : index
      %67 = vector.load %arg5[%c0_19, %c0_20, %c0_21, %c0_22] : memref<1x1x4x128xf32, #tpu.memory_space<vmem>>, vector<1x1x4x128xf32>
      %68 = vector.shape_cast %67 : vector<1x1x4x128xf32> to vector<4x128xf32>
      %69 = vector.shape_cast %66 : vector<4x128xf32> to vector<1x1x4x128xf32>
      tpu.vector_store %arg5[%c0_19, %c0_20, %c0_21, %c0_22], %69 {strides = array<i32>} : memref<1x1x4x128xf32, #tpu.memory_space<vmem>>, vector<1x1x4x128xf32>,
      %c0_23 = arith.constant 0 : index
      %c0_24 = arith.constant 0 : index
      %c0_25 = arith.constant 0 : index
      %c0_26 = arith.constant 0 : index
      %70 = vector.load %arg6[%c0_23, %c0_24, %c0_25, %c0_26] : memref<1x1x4x128xf32, #tpu.memory_space<vmem>>, vector<1x1x4x128xf32>
      %71 = vector.shape_cast %70 : vector<1x1x4x128xf32> to vector<4x128xf32>
      %72 = arith.addf %71, %62 : vector<4x128xf32>
      %c0_27 = arith.constant 0 : index
      %c0_28 = arith.constant 0 : index
      %c0_29 = arith.constant 0 : index
      %c0_30 = arith.constant 0 : index
      %73 = vector.load %arg6[%c0_27, %c0_28, %c0_29, %c0_30] : memref<1x1x4x128xf32, #tpu.memory_space<vmem>>, vector<1x1x4x128xf32>
      %74 = vector.shape_cast %73 : vector<1x1x4x128xf32> to vector<4x128xf32>
      %75 = vector.shape_cast %72 : vector<4x128xf32> to vector<1x1x4x128xf32>
      tpu.vector_store %arg6[%c0_27, %c0_28, %c0_29, %c0_30], %75 {strides = array<i32>} : memref<1x1x4x128xf32, #tpu.memory_space<vmem>>, vector<1x1x4x128xf32>,
      %c0_31 = arith.constant 0 : index
      %c0_32 = arith.constant 0 : index
      %c0_33 = arith.constant 0 : index
      %c0_34 = arith.constant 0 : index
      %76 = vector.load %arg7[%c0_31, %c0_32, %c0_33, %c0_34] : memref<1x1x4x128xf32, #tpu.memory_space<vmem>>, vector<1x1x4x128xf32>
      %77 = vector.shape_cast %76 : vector<1x1x4x128xf32> to vector<4x128xf32>
      %78 = arith.addf %77, %63 : vector<4x128xf32>
      %c0_35 = arith.constant 0 : index
      %c0_36 = arith.constant 0 : index
      %c0_37 = arith.constant 0 : index
      %c0_38 = arith.constant 0 : index
      %79 = vector.load %arg7[%c0_35, %c0_36, %c0_37, %c0_38] : memref<1x1x4x128xf32, #tpu.memory_space<vmem>>, vector<1x1x4x128xf32>
      %80 = vector.shape_cast %79 : vector<1x1x4x128xf32> to vector<4x128xf32>
      %81 = vector.shape_cast %78 : vector<4x128xf32> to vector<1x1x4x128xf32>
      tpu.vector_store %arg7[%c0_35, %c0_36, %c0_37, %c0_38], %81 {strides = array<i32>} : memref<1x1x4x128xf32, #tpu.memory_space<vmem>>, vector<1x1x4x128xf32>,
    } else {
    }
    %c0_i32_3 = arith.constant 0 : i32
    %9 = arith.cmpi eq, %1, %c0_i32_3 : i32
    %10 = arith.extui %9 : i1 to i32
    %c0_i32_4 = arith.constant 0 : i32
    %11 = arith.cmpi ne, %10, %c0_i32_4 : i32
    scf.if %11 {
      %c0 = arith.constant 0 : index
      %c0_5 = arith.constant 0 : index
      %c0_6 = arith.constant 0 : index
      %12 = vector.load %arg3[%c0, %c0_5, %c0_6] : memref<1x4x512xf32, #tpu.memory_space<vmem>>, vector<1x4x512xf32>
      %13 = vector.shape_cast %12 : vector<1x4x512xf32> to vector<4x512xf32>
      %c0_7 = arith.constant 0 : index
      %c0_8 = arith.constant 0 : index
      %c0_9 = arith.constant 0 : index
      %14 = vector.load %arg4[%c0_7, %c0_8, %c0_9] : memref<1x1x512xi8, #tpu.memory_space<vmem>>, vector<1x1x512xi8>
      %15 = vector.shape_cast %14 : vector<1x1x512xi8> to vector<1x512xi8>
      %16 = arith.extsi %15 : vector<1x512xi8> to vector<1x512xi32>
      %17 = tpu.iota {dimensions = array<i32: 1>} : vector<1x512xi32>
      %c256_i32 = arith.constant 256 : i32
      %18 = vector.broadcast %c256_i32 : i32 to vector<1x512xi32>
      %19 = arith.cmpi slt, %17, %18 : vector<1x512xi32>
      %cst = arith.constant dense<0xFF800000> : vector<512xf32>
      %20 = vector.multi_reduction <maximumf>, %13, %cst [0] : vector<4x512xf32> to vector<512xf32>
      %21 = vector.shape_cast %20 : vector<512xf32> to vector<1x512xf32>
      %22 = vector.broadcast %21 : vector<1x512xf32> to vector<4x512xf32>
      %23 = arith.subf %13, %22 : vector<4x512xf32>
      %24 = math.exp %23 : vector<4x512xf32>
      %cst_10 = arith.constant dense<0.000000e+00> : vector<512xf32>
      %25 = vector.multi_reduction <add>, %24, %cst_10 [0] : vector<4x512xf32> to vector<512xf32>
      %26 = vector.shape_cast %25 : vector<512xf32> to vector<1x512xf32>
      %27 = tpu.reciprocal %26 : vector<1x512xf32> -> vector<1x512xf32>
      %28 = vector.broadcast %27 : vector<1x512xf32> to vector<4x512xf32>
      %29 = arith.mulf %24, %28 : vector<4x512xf32>
      %cst_11 = arith.constant 0.000000e+00 : f32
      %30 = vector.shape_cast %19 : vector<1x512xi1> to vector<1x512xi1>
      %31 = vector.broadcast %30 : vector<1x512xi1> to vector<4x512xi1>
      %32 = vector.broadcast %cst_11 : f32 to vector<4x512xf32>
      %33 = arith.select %31, %29, %32 : vector<4x512xi1>, vector<4x512xf32>
      %c-1_i32 = arith.constant -1 : i32
      %34 = vector.broadcast %c-1_i32 : i32 to vector<1x512xi32>
      %35 = arith.select %19, %16, %34 : vector<1x512xi1>, vector<1x512xi32>
      %36 = vector.broadcast %35 : vector<1x512xi32> to vector<4x512xi32>
      %37 = arith.cmpi eq, %36, %5 : vector<4x512xi32>
      %cst_12 = arith.constant 0.000000e+00 : f32
      %38 = vector.broadcast %cst_12 : f32 to vector<4x512xf32>
      %39 = arith.select %37, %33, %38 : vector<4x512xi1>, vector<4x512xf32>
      %40 = vector.extract_strided_slice %39 {offsets = [0, 0], sizes = [4, 128], strides = [1, 1]} : vector<4x512xf32> to vector<4x128xf32>
      %41 = vector.extract_strided_slice %39 {offsets = [0, 128], sizes = [4, 128], strides = [1, 1]} : vector<4x512xf32> to vector<4x128xf32>
      %42 = vector.extract_strided_slice %39 {offsets = [0, 256], sizes = [4, 128], strides = [1, 1]} : vector<4x512xf32> to vector<4x128xf32>
      %43 = vector.extract_strided_slice %39 {offsets = [0, 384], sizes = [4, 128], strides = [1, 1]} : vector<4x512xf32> to vector<4x128xf32>
      %44 = arith.addf %40, %41 : vector<4x128xf32>
      %45 = arith.addf %42, %43 : vector<4x128xf32>
      %46 = arith.addf %44, %45 : vector<4x128xf32>
      %47 = arith.mulf %33, %33 : vector<4x512xf32>
      %48 = vector.extract_strided_slice %47 {offsets = [0, 0], sizes = [4, 128], strides = [1, 1]} : vector<4x512xf32> to vector<4x128xf32>
      %49 = vector.extract_strided_slice %47 {offsets = [0, 128], sizes = [4, 128], strides = [1, 1]} : vector<4x512xf32> to vector<4x128xf32>
      %50 = vector.extract_strided_slice %47 {offsets = [0, 256], sizes = [4, 128], strides = [1, 1]} : vector<4x512xf32> to vector<4x128xf32>
      %51 = vector.extract_strided_slice %47 {offsets = [0, 384], sizes = [4, 128], strides = [1, 1]} : vector<4x512xf32> to vector<4x128xf32>
      %52 = arith.addf %48, %49 : vector<4x128xf32>
      %53 = arith.addf %50, %51 : vector<4x128xf32>
      %54 = arith.addf %52, %53 : vector<4x128xf32>
      %cst_13 = arith.constant 1.000000e+00 : f32
      %cst_14 = arith.constant 0.000000e+00 : f32
      %55 = vector.broadcast %cst_13 : f32 to vector<4x512xf32>
      %56 = vector.broadcast %cst_14 : f32 to vector<4x512xf32>
      %57 = arith.select %37, %55, %56 : vector<4x512xi1>, vector<4x512xf32>
      %58 = vector.extract_strided_slice %57 {offsets = [0, 0], sizes = [4, 128], strides = [1, 1]} : vector<4x512xf32> to vector<4x128xf32>
      %59 = vector.extract_strided_slice %57 {offsets = [0, 128], sizes = [4, 128], strides = [1, 1]} : vector<4x512xf32> to vector<4x128xf32>
      %60 = vector.extract_strided_slice %57 {offsets = [0, 256], sizes = [4, 128], strides = [1, 1]} : vector<4x512xf32> to vector<4x128xf32>
      %61 = vector.extract_strided_slice %57 {offsets = [0, 384], sizes = [4, 128], strides = [1, 1]} : vector<4x512xf32> to vector<4x128xf32>
      %62 = arith.addf %58, %59 : vector<4x128xf32>
      %63 = arith.addf %60, %61 : vector<4x128xf32>
      %64 = arith.addf %62, %63 : vector<4x128xf32>
      %c0_15 = arith.constant 0 : index
      %c0_16 = arith.constant 0 : index
      %c0_17 = arith.constant 0 : index
      %c0_18 = arith.constant 0 : index
      %65 = vector.load %arg5[%c0_15, %c0_16, %c0_17, %c0_18] : memref<1x1x4x128xf32, #tpu.memory_space<vmem>>, vector<1x1x4x128xf32>
      %66 = vector.shape_cast %65 : vector<1x1x4x128xf32> to vector<4x128xf32>
      %67 = arith.addf %66, %46 : vector<4x128xf32>
      %c0_19 = arith.constant 0 : index
      %c0_20 = arith.constant 0 : index
      %c0_21 = arith.constant 0 : index
      %c0_22 = arith.constant 0 : index
      %68 = vector.load %arg5[%c0_19, %c0_20, %c0_21, %c0_22] : memref<1x1x4x128xf32, #tpu.memory_space<vmem>>, vector<1x1x4x128xf32>
      %69 = vector.shape_cast %68 : vector<1x1x4x128xf32> to vector<4x128xf32>
      %70 = vector.shape_cast %67 : vector<4x128xf32> to vector<1x1x4x128xf32>
      tpu.vector_store %arg5[%c0_19, %c0_20, %c0_21, %c0_22], %70 {strides = array<i32>} : memref<1x1x4x128xf32, #tpu.memory_space<vmem>>, vector<1x1x4x128xf32>,
      %c0_23 = arith.constant 0 : index
      %c0_24 = arith.constant 0 : index
      %c0_25 = arith.constant 0 : index
      %c0_26 = arith.constant 0 : index
      %71 = vector.load %arg6[%c0_23, %c0_24, %c0_25, %c0_26] : memref<1x1x4x128xf32, #tpu.memory_space<vmem>>, vector<1x1x4x128xf32>
      %72 = vector.shape_cast %71 : vector<1x1x4x128xf32> to vector<4x128xf32>
      %73 = arith.addf %72, %54 : vector<4x128xf32>
      %c0_27 = arith.constant 0 : index
      %c0_28 = arith.constant 0 : index
      %c0_29 = arith.constant 0 : index
      %c0_30 = arith.constant 0 : index
      %74 = vector.load %arg6[%c0_27, %c0_28, %c0_29, %c0_30] : memref<1x1x4x128xf32, #tpu.memory_space<vmem>>, vector<1x1x4x128xf32>
      %75 = vector.shape_cast %74 : vector<1x1x4x128xf32> to vector<4x128xf32>
      %76 = vector.shape_cast %73 : vector<4x128xf32> to vector<1x1x4x128xf32>
      tpu.vector_store %arg6[%c0_27, %c0_28, %c0_29, %c0_30], %76 {strides = array<i32>} : memref<1x1x4x128xf32, #tpu.memory_space<vmem>>, vector<1x1x4x128xf32>,
      %c0_31 = arith.constant 0 : index
      %c0_32 = arith.constant 0 : index
      %c0_33 = arith.constant 0 : index
      %c0_34 = arith.constant 0 : index
      %77 = vector.load %arg7[%c0_31, %c0_32, %c0_33, %c0_34] : memref<1x1x4x128xf32, #tpu.memory_space<vmem>>, vector<1x1x4x128xf32>
      %78 = vector.shape_cast %77 : vector<1x1x4x128xf32> to vector<4x128xf32>
      %79 = arith.addf %78, %64 : vector<4x128xf32>
      %c0_35 = arith.constant 0 : index
      %c0_36 = arith.constant 0 : index
      %c0_37 = arith.constant 0 : index
      %c0_38 = arith.constant 0 : index
      %80 = vector.load %arg7[%c0_35, %c0_36, %c0_37, %c0_38] : memref<1x1x4x128xf32, #tpu.memory_space<vmem>>, vector<1x1x4x128xf32>
      %81 = vector.shape_cast %80 : vector<1x1x4x128xf32> to vector<4x128xf32>
      %82 = vector.shape_cast %79 : vector<4x128xf32> to vector<1x1x4x128xf32>
      tpu.vector_store %arg7[%c0_35, %c0_36, %c0_37, %c0_38], %82 {strides = array<i32>} : memref<1x1x4x128xf32, #tpu.memory_space<vmem>>, vector<1x1x4x128xf32>,
    } else {
    }
    return
  }
  func.func @transform_0(%arg0: i32, %arg1: i32, %arg2: i32) -> (i32, i32, i32) {
    %c1_i32 = arith.constant 1 : i32
    %0 = arith.muli %arg0, %c1_i32 : i32
    %1 = arith.addi %0, %arg2 : i32
    %c0_i32 = arith.constant 0 : i32
    %c0_i32_0 = arith.constant 0 : i32
    return %arg1, %c0_i32, %1 : i32, i32, i32
  }
  func.func @transform_1(%arg0: i32, %arg1: i32, %arg2: i32) -> (i32, i32, i32) {
    %c1_i32 = arith.constant 1 : i32
    %0 = arith.muli %arg0, %c1_i32 : i32
    %1 = arith.addi %0, %arg2 : i32
    %c0_i32 = arith.constant 0 : i32
    %c0_i32_0 = arith.constant 0 : i32
    return %arg1, %c0_i32, %1 : i32, i32, i32
  }
  func.func @transform_2(%arg0: i32, %arg1: i32, %arg2: i32) -> (i32, i32, i32, i32) {
    %c0_i32 = arith.constant 0 : i32
    %c0_i32_0 = arith.constant 0 : i32
    %c0_i32_1 = arith.constant 0 : i32
    return %arg0, %arg1, %c0_i32, %c0_i32_0 : i32, i32, i32, i32
  }
  func.func @transform_3(%arg0: i32, %arg1: i32, %arg2: i32) -> (i32, i32, i32, i32) {
    %c0_i32 = arith.constant 0 : i32
    %c0_i32_0 = arith.constant 0 : i32
    %c0_i32_1 = arith.constant 0 : i32
    return %arg0, %arg1, %c0_i32, %c0_i32_0 : i32, i32, i32, i32
  }
  func.func @transform_4(%arg0: i32, %arg1: i32, %arg2: i32) -> (i32, i32, i32, i32) {
    %c0_i32 = arith.constant 0 : i32
    %c0_i32_0 = arith.constant 0 : i32
    %c0_i32_1 = arith.constant 0 : i32
    return %arg0, %arg1, %c0_i32, %c0_i32_0 : i32, i32, i32, i32
  }
}

</mosaic_0001>

<bundles_post_ra>
// kernel: dice_loss.1
= control target key start
LH: loop header
LB: loop body
LE: loop exit
PB: predicated region body
PF: predicated region fallthrough
CT: control target
= control target key end

     0   :  { %s1040_s15 = smov 0   ;;  %s1042_s16 = smov 0   ;;  %s1112_s0 = inlined_call_operand.vmem [shape: f32[2,4,256], index: 0, kind: input, shape index: {}]   ;;  %s1113_s1 = inlined_call_operand.vmem [shape: s8[2,1,256], index: 1, kind: input, shape index: {}]   ;;  %s1114_s2 = inlined_call_operand.vmem [shape: f32[1,2,4,128], index: 2, kind: output, shape index: {0}]   ;;  %s1115_s3 = inlined_call_operand.vmem [shape: f32[1,2,4,128], index: 3, kind: output, shape index: {1}]   ;;  %s1116_s4 = inlined_call_operand.vmem [shape: f32[1,2,4,128], index: 4, kind: output, shape index: {2}]  }
   0x1   :  { %s1044_s17 = smov 0  }
   0x2 LB: > { %s30_s18 = sadd.s32 1, %s1007_s16  ;;  %p946_p0 = scmp.ge.s32.totalorder %s1011_s17, 1  ;;  %s1011_s17 = sphi %s1044_s17, %s15_s17   ;;  %s1007_s16 = sphi %s1042_s16, %s1122_s16   ;;  %s1003_s15 = sphi %s1040_s15, %s1121_s15  }
   0x3   : > { %p32_p1 = scmp.ge.s32.totalorder %s30_s18, 2  ;;  %p231_p2 = scmp.lt.s32.totalorder %s1011_s17, 3 }
   0x5   : > { %s1124_s18 = smov (%p32_p1, %s30_s18), 0  ;;  %p232_p3 = pnand %p946_p0, %p231_p2 }
   0x6   : > { %p298_p4 = scmp.lt.s32.totalorder (!%p232_p3), %s1003_s15, 1  ;;  %v357_v0 = vlaneseq (!%p232_p3)  ;;  %vm568_vm0 = vcmask (!%p232_p3), 1043456   ;;  %v1013_v6 = vmov (!%p232_p3), 4294967295   ;;  %v1014_v11 = vmov (!%p232_p3), 0.0  }
   0x7   : > { %235 = sbr.rel (%p232_p3) target bundleno = 89 (0x59), region = 28 }
   0x8   : > { %v358_v1 = vshrl.u32 (!%p232_p3), %v357_v0, 7 }
   0xa   : > { %v679_v2 = vsub.s32 (!%p232_p3), 0, %v358_v1  ;;  %v683_v3 = vsub.s32 (!%p232_p3), 4, %v358_v1 }
   0xc   : > { %v708_v7 = vrot.slane (!%p232_p3), %v1013_v6, %v679_v2 }
   0xe   : > { %s1126_s15 = smov (!%p298_p4, %s1003_s15), 1  ;;  %vm715_vm1 = vcmp.eq.s32.totalorder %v708_v7, %v358_v1 }
   0xf   : > { %s955_s19 = sshll.u32 %s1126_s15, 3  ;;  %s949_s20 = sshll.u32 %s1126_s15, 1  ;;  %v733_v18 = vsel %vm715_vm1, 1.0, %v1014_v11 }
  0x10   : > { %s305_s23 = scalar_lea.vmem %s1112_s0, %s955_s19  ;;  %s320_s26 = scalar_lea.vmem %s1113_s1, %s949_s20  ;;  %v736_v25 = vadd.f32 %v733_v18, %v733_v18 }
  0x11   : > { %s950_s27 = sshll.u32 %s1126_s15, 2  ;;  %v548_v4 = vld [vmem:[%s305_s23] sm:$0xff] }
  0x12   : > { %v550_v5 = vld [vmem:[%s320_s26] sm:$0x3]  ;;  %s1067_s30 = scalar_lea.vmem %s1114_s2, %s950_s27  ;;  %v564_v9 = vcombine.high %v548_v4, %v548_v4  ;;  %v569_v10 = vsel %vm568_vm0, %v548_v4, -inf  ;;  %s1073_s7 = scalar_lea.vmem %s1115_s3, %s950_s27 }
  0x13   : > { %v551_v8 = vunpack.c.0.s8 %v550_v5  ;;  %354 = vst [vmem:[%s1067_s30] sm:$0xf] %v1014_v11  ;;  %v570_v12 = vrot.slane %v569_v10, 4  ;;  %355 = vst [vmem:[%s1073_s7] sm:$0xf] %v1014_v11  ;;  %s348_s10 = scalar_lea.vmem %s1116_s4, %s950_s27 }
  0x14   : > { %v576_v13 = vsel %vm568_vm0, %v564_v9, -inf  ;;  %356 = vst [vmem:[%s348_s10] sm:$0xf] %v1014_v11 }
  0x15   : > { %v680_v14 = vrot.slane %v551_v8, %v679_v2  ;;  %v684_v15 = vrot.slane %v551_v8, %v683_v3  ;;  %v571_v16 = vmax.f32 %v569_v10, %v570_v12  ;;  %v577_v17 = vrot.slane %v576_v13, 4 }
  0x17   : > { %v700_v19 = vrot.slane %v680_v14, %v679_v2  ;;  %v704_v20 = vrot.slane %v684_v15, %v679_v2  ;;  %v572_v21 = vrot.slane %v571_v16, 2  ;;  %v578_v22 = vmax.f32 %v576_v13, %v577_v17 }
  0x19   : > { %vm1081_vm2 = vcmp.eq.s32.totalorder %v700_v19, %v358_v1  ;;  %vm1085_vm3 = vcmp.eq.s32.totalorder %v704_v20, %v358_v1  ;;  %v573_v26 = vmax.f32 %v571_v16, %v572_v21  ;;  %v579_v27 = vrot.slane %v578_v22, 2 }
  0x1a   : > { %v731_v28 = vsel %vm1081_vm2, 1.0, %v1014_v11  ;;  %v732_v29 = vsel %vm1085_vm3, 1.0, %v1014_v11  ;;  %v738_v2 = vld [vmem:[%s1067_s30] sm:$0xf] }
  0x1b   : > { %v735_v30 = vadd.f32 %v732_v29, %v731_v28  ;;  %v574_v31 = vrot.slane %v573_v26, 1  ;;  %v580_v32 = vmax.f32 %v578_v22, %v579_v27  ;;  %v744_v33 = vld [vmem:[%s348_s10] sm:$0xf] }
  0x1c   : > { %v741_v5 = vld [vmem:[%s1073_s7] sm:$0xf] }
  0x1d   : > { %v737_v34 = vadd.f32 %v736_v25, %v735_v30  ;;  %v575_v35 = vmax.f32 %v573_v26, %v574_v31  ;;  %v581_v36 = vrot.slane %v580_v32, 1 }
  0x1f   : > { %v745_v37 = vadd.f32 %v744_v33, %v737_v34  ;;  %v582_v38 = vmax.f32 %v580_v32, %v581_v36 }
  0x21   : > { %746 = vst [vmem:[%s348_s10] sm:$0xf] %v745_v37  ;;  %v601_v39 = vcombine.low %v575_v35, %v582_v38 }
  0x23   : > { %v605_v40 = vsub.f32 %v548_v4, %v601_v39 }
  0x25   : > { %v607_v41 = vmul.f32 1.442695, %v605_v40 }
  0x27   : > { %983 = vpow2.f32 %v607_v41 }
  0x31   : > { %v984_v42 = vpop.eup %983 }
  0x32   : > { %v613_v43 = vcombine.high %v984_v42, %v984_v42  ;;  %v617_v44 = vsel %vm568_vm0, %v984_v42, 0.0 }
  0x33   : > { %v618_v45 = vrot.slane %v617_v44, 4 }
  0x34   : > { %v624_v46 = vsel %vm568_vm0, %v613_v43, 0.0 }
  0x35   : > { %v619_v47 = vadd.f32 %v618_v45, %v617_v44  ;;  %v625_v48 = vrot.slane %v624_v46, 4 }
  0x37   : > { %v620_v49 = vrot.slane %v619_v47, 2  ;;  %v626_v50 = vadd.f32 %v625_v48, %v624_v46 }
  0x39   : > { %v621_v51 = vadd.f32 %v620_v49, %v619_v47  ;;  %v627_v52 = vrot.slane %v626_v50, 2 }
  0x3b   : > { %v628_v53 = vadd.f32 %v627_v52, %v626_v50  ;;  %v622_v54 = vrot.slane %v621_v51, 1 }
  0x3d   : > { %v623_v55 = vadd.f32 %v622_v54, %v621_v51  ;;  %v629_v56 = vrot.slane %v628_v53, 1 }
  0x3f   : > { %v630_v57 = vadd.f32 %v629_v56, %v628_v53  ;;  %985 = vrcp.f32 %v623_v55 }
  0x41   : > { %987 = vrcp.f32 %v630_v57 }
  0x49   : > { %v986_v58 = vpop.eup %985 }
  0x4b   : > { %v988_v59 = vpop.eup %987 }
  0x4c   : > { %v653_v60 = vcombine.low %v986_v58, %v988_v59 }
  0x4e   : > { %v657_v61 = vmul.f32 %v984_v42, %v653_v60 }
  0x50   : > { %v669_v62 = vcombine.high %v657_v61, %v657_v61  ;;  %v717_v63 = vsel %vm1081_vm2, %v657_v61, 0.0  ;;  %v724_v0 = vmul.f32 %v657_v61, %v657_v61 }
  0x52   : > { %v718_v1 = vsel %vm1085_vm3, %v669_v62, 0.0  ;;  %v725_v3 = vmul.f32 %v669_v62, %v669_v62 }
  0x53   : > { %v721_v4 = vadd.f32 %v718_v1, %v717_v63 }
  0x54   : > { %v728_v6 = vadd.f32 %v725_v3, %v724_v0 }
  0x55   : > { %v739_v7 = vadd.f32 %v738_v2, %v721_v4 }
  0x56   : > { %v742_v8 = vadd.f32 %v741_v5, %v728_v6 }
  0x57   : > { %740 = vst [vmem:[%s1067_s30] sm:$0xf] %v739_v7 }
  0x58   : > { %743 = vst [vmem:[%s1073_s7] sm:$0xf] %v742_v8 }
  0x59 PF: > { %s15_s17 = sadd.s32 1, %s1011_s17   ;;  %s1121_s15 = smov %s1007_s16 }
  0x5a   : > { %p12_p5 = scmp.ge.s32.totalorder %s15_s17, 4   ;;  %s1122_s16 = smov %s1124_s18 }
  0x5c   :  { %14 = sbr.rel (!%p12_p5) target bundleno = 2 (0x2), region = 97 }

</bundles_post_ra>
